<compile_context>
chip_gen: v5e
topology: v5e:2x2
jax: 0.10.0
libtpu: 0.0.40
codegen_flags: <defaults>
</compile_context>

<pallas_src>
import math

import jax
import jax.numpy as jnp
from jax.experimental import pallas as pl
from jax.experimental.pallas import tpu as pltpu


_SQRT_HALF = 0.7071067811865476
_VMEM_BUDGET = 48 * 1024 * 1024   # conservative: v7x has 64 MiB VMEM per TC
_VMEM_LIMIT = 64 * 1024 * 1024    # explicit scoped-VMEM limit (> default 16/32 MiB)


def _cdiv(a, b):
    return -(-a // b)


def _round_up(v, m):
    return _cdiv(v, m) * m


def _erf(x):
    # Abramowitz & Stegun 7.1.26 rational approximation (max abs err ~1.5e-7
    # before the approximate reciprocal).  exp + reciprocal run on the EUP
    # slot; the rest is cheap VPU mul/add/select.
    a1, a2, a3, a4, a5 = (0.254829592, -0.284496736, 1.421413741,
                          -1.453152027, 1.061405429)
    p = 0.3275911
    s = jnp.where(x >= 0.0, 1.0, -1.0)
    ax = jnp.abs(x)
    t = pl.reciprocal(1.0 + p * ax, approx=True)
    poly = ((((a5 * t + a4) * t + a3) * t + a2) * t + a1) * t
    return s * (1.0 - poly * jnp.exp(-ax * ax))


def _gelu_exact(x):
    # Matches torch.nn.functional.gelu (erf-based, non-approximate).
    return 0.5 * x * (1.0 + _erf(x * _SQRT_HALF))


def _ffn_kernel_resident(x_ref, w1h_ref, w1g_ref, b1h_ref, b1g_ref,
                         w2_ref, b2_ref, o_ref):
    # x_ref: (tile_m, dim_p); w1h/w1g: (dim_p, inner_p); w2: (inner_p, dim_out_p)
    x = x_ref[...]
    h = jnp.dot(x, w1h_ref[...], preferred_element_type=jnp.float32) + b1h_ref[...]
    g = jnp.dot(x, w1g_ref[...], preferred_element_type=jnp.float32) + b1g_ref[...]
    a = h * _gelu_exact(g)                               # GEGLU, f32
    out = jnp.dot(a.astype(w2_ref.dtype), w2_ref[...],
                  preferred_element_type=jnp.float32)
    o_ref[...] = (out + b2_ref[...]).astype(o_ref.dtype)


def _ffn_kernel_chunked(x_ref, w1h_ref, w1g_ref, b1h_ref, b1g_ref,
                        w2_ref, b2_ref, o_ref, acc_ref):
    # Streams inner-dim chunks: w1h/w1g: (dim_p, ck); w2: (ck, dim_out_p).
    k = pl.program_id(1)

    @pl.when(k == 0)
    def _():
        acc_ref[...] = jnp.zeros_like(acc_ref)

    x = x_ref[...]
    h = jnp.dot(x, w1h_ref[...], preferred_element_type=jnp.float32) + b1h_ref[...]
    g = jnp.dot(x, w1g_ref[...], preferred_element_type=jnp.float32) + b1g_ref[...]
    a = h * _gelu_exact(g)
    acc_ref[...] += jnp.dot(a.astype(w2_ref.dtype), w2_ref[...],
                            preferred_element_type=jnp.float32)

    @pl.when(k == pl.num_programs(1) - 1)
    def _():
        o_ref[...] = (acc_ref[...] + b2_ref[...]).astype(o_ref.dtype)


def feed_forward(x, w1, b1, w2, b2, *, tile_m=None, inner_chunk=None,
                 compute_dtype=None):
    """GEGLU feed-forward: out = (h * gelu(g)) @ w2 + b2, [h|g] = x @ w1 + b1.

    x:  (..., dim)
    w1: (dim, 2*inner)    b1: (2*inner,)
    w2: (inner, dim_out)  b2: (dim_out,)
    compute_dtype: optional MXU operand dtype (e.g. jnp.bfloat16); accumulation
                   and GELU are always f32, output keeps x.dtype.
    """
    *lead, dim = x.shape
    two_inner = w1.shape[1]
    inner = two_inner // 2
    dim_out = w2.shape[1]
    assert w1.shape == (dim, 2 * inner)
    assert w2.shape == (inner, dim_out)
    assert b1.shape == (two_inner,) and b2.shape == (dim_out,)

    out_dtype = x.dtype
    cdtype = jnp.dtype(compute_dtype) if compute_dtype is not None else x.dtype
    wbytes = jnp.dtype(cdtype).itemsize

    m = int(math.prod(lead)) if lead else 1
    x2 = x.reshape(m, dim).astype(cdtype)
    w1h = w1[:, :inner].astype(cdtype)
    w1g = w1[:, inner:].astype(cdtype)
    w2c = w2.astype(cdtype)
    b1h = b1[:inner].astype(jnp.float32).reshape(1, inner)
    b1g = b1[inner:].astype(jnp.float32).reshape(1, inner)
    b2f = b2.astype(jnp.float32).reshape(1, dim_out)

    # Lane-dense, (8,128)-aligned feature padding.
    dim_p = _round_up(dim, 128)
    dim_out_p = _round_up(dim_out, 128)
    inner_p128 = _round_up(inner, 128)

    # Row tile: avoid the m_p >> m overshoot of a fixed tile size.
    base_tile = 1024 if wbytes <= 2 else 512
    if tile_m is None:
        m8 = _round_up(m, 8)
        if m8 <= base_tile:
            tile_m = m8
        else:
            tile_m = _round_up(_cdiv(m, _cdiv(m, base_tile)), 128)
    m_p = _round_up(m, tile_m)

    # Weight strategy: resident only if the (double-buffered) footprint fits.
    def _resident_need(inner_pad):
        weights = (2 * dim_p * inner_pad + inner_pad * dim_out_p) * wbytes
        biases = (2 * inner_pad + dim_out_p) * 4
        io = tile_m * (dim_p + dim_out_p) * wbytes
        interm = tile_m * (2 * inner_pad + dim_out_p) * 4   # h, g, out in f32
        return 2 * (weights + biases + io) + interm

    use_chunked = (inner_chunk is not None) or \
                  (_resident_need(inner_p128) > _VMEM_BUDGET)
    if use_chunked:
        ck = inner_chunk if inner_chunk is not None else 512
        ck = max(128, _round_up(min(ck, inner_p128), 128))
        inner_p = _round_up(inner, ck)
    else:
        ck = None
        inner_p = inner_p128

    def _pad2(a, rows, cols):
        r0, c0 = a.shape
        if (r0, c0) == (rows, cols):
            return a                     # skip the extra HBM pass when aligned
        return jnp.zeros((rows, cols), a.dtype).at[:r0, :c0].set(a)

    x_p = _pad2(x2, m_p, dim_p)
    w1h_p = _pad2(w1h, dim_p, inner_p)
    w1g_p = _pad2(w1g, dim_p, inner_p)
    w2_p = _pad2(w2c, inner_p, dim_out_p)
    b1h_p = _pad2(b1h, 1, inner_p)
    b1g_p = _pad2(b1g, 1, inner_p)
    b2_p = _pad2(b2f, 1, dim_out_p)

    if not use_chunked:
        grid = (m_p // tile_m,)
        out_p = pl.pallas_call(
            _ffn_kernel_resident,
            out_shape=jax.ShapeDtypeStruct((m_p, dim_out_p), out_dtype),
            grid_spec=pltpu.PrefetchScalarGridSpec(
                num_scalar_prefetch=0,
                grid=grid,
                in_specs=[
                    pl.BlockSpec((tile_m, dim_p), lambda i: (i, 0)),
                    # Weights / biases: constant block index -> VMEM resident.
                    pl.BlockSpec((dim_p, inner_p), lambda i: (0, 0)),
                    pl.BlockSpec((dim_p, inner_p), lambda i: (0, 0)),
                    pl.BlockSpec((1, inner_p), lambda i: (0, 0)),
                    pl.BlockSpec((1, inner_p), lambda i: (0, 0)),
                    pl.BlockSpec((inner_p, dim_out_p), lambda i: (0, 0)),
                    pl.BlockSpec((1, dim_out_p), lambda i: (0, 0)),
                ],
                out_specs=pl.BlockSpec((tile_m, dim_out_p), lambda i: (i, 0)),
            ),
            compiler_params=pltpu.CompilerParams(
                dimension_semantics=("parallel",),
                vmem_limit_bytes=_VMEM_LIMIT,
            ),
        )(x_p, w1h_p, w1g_p, b1h_p, b1g_p, w2_p, b2_p)
    else:
        grid = (m_p // tile_m, inner_p // ck)   # reduction axis last, "arbitrary"
        out_p = pl.pallas_call(
            _ffn_kernel_chunked,
            out_shape=jax.ShapeDtypeStruct((m_p, dim_out_p), out_dtype),
            grid_spec=pltpu.PrefetchScalarGridSpec(
                num_scalar_prefetch=0,
                grid=grid,
                in_specs=[
                    pl.BlockSpec((tile_m, dim_p), lambda i, k: (i, 0)),
                    pl.BlockSpec((dim_p, ck), lambda i, k: (0, k)),
                    pl.BlockSpec((dim_p, ck), lambda i, k: (0, k)),
                    pl.BlockSpec((1, ck), lambda i, k: (0, k)),
                    pl.BlockSpec((1, ck), lambda i, k: (0, k)),
                    pl.BlockSpec((ck, dim_out_p), lambda i, k: (k, 0)),
                    pl.BlockSpec((1, dim_out_p), lambda i, k: (0, 0)),
                ],
                out_specs=pl.BlockSpec((tile_m, dim_out_p), lambda i, k: (i, 0)),
                scratch_shapes=[pltpu.VMEM((tile_m, dim_out_p), jnp.float32)],
            ),
            compiler_params=pltpu.CompilerParams(
                dimension_semantics=("parallel", "arbitrary"),
                vmem_limit_bytes=_VMEM_LIMIT,
            ),
        )(x_p, w1h_p, w1g_p, b1h_p, b1g_p, w2_p, b2_p)

    out = out_p
    if (m_p, dim_out_p) != (m, dim_out):
        out = out[:m, :dim_out]
    return out.reshape(*lead, dim_out)


if __name__ == "__main__":
    def reference(x, w1, b1, w2, b2):
        hg = jnp.dot(x, w1, precision=jax.lax.Precision.HIGHEST) + b1
        h, g = jnp.split(hg, 2, axis=-1)
        a = h * jax.nn.gelu(g, approximate=False)
        return jnp.dot(a, w2, precision=jax.lax.Precision.HIGHEST) + b2

    def make_inputs(key, batch, seq, dim, mult, dim_out):
        inner = dim * mult
        kx, k1, kb1, k2, kb2 = jax.random.split(key, 5)
        x = jax.random.normal(kx, (batch, seq, dim), dtype=jnp.float32)
        w1 = jax.random.normal(k1, (dim, 2 * inner), jnp.float32) / math.sqrt(dim)
        b1 = jax.random.normal(kb1, (2 * inner,), jnp.float32) * 0.02
        w2 = jax.random.normal(k2, (inner, dim_out), jnp.float32) / math.sqrt(inner)
        b2 = jax.random.normal(kb2, (dim_out,), jnp.float32) * 0.02
        return x, w1, b1, w2, b2

    key = jax.random.PRNGKey(0)
    ka, kb = jax.random.split(key)

    # 1) Resident-weight path: FeedForward(dim=32, mult=4, "geglu") on (2, 8, 32).
    x, w1, b1, w2, b2 = make_inputs(ka, 2, 8, 32, 4, 32)
    out = jax.block_until_ready(feed_forward(x, w1, b1, w2, b2))
    ref = reference(x, w1, b1, w2, b2)
    assert out.shape == (2, 8, 32)
    assert jnp.allclose(out, ref, atol=1e-2, rtol=1e-2), (
        f"resident path mismatch, max abs err {jnp.max(jnp.abs(out - ref))}")

    # 2) Inner-dim streaming path (forced): dim=64 -> inner=256, two 128-col chunks.
    x2, w1b, b1b, w2b, b2b = make_inputs(kb, 2, 16, 64, 4, 64)
    out2 = jax.block_until_ready(
        feed_forward(x2, w1b, b1b, w2b, b2b, inner_chunk=128))
    ref2 = reference(x2, w1b, b1b, w2b, b2b)
    assert out2.shape == (2, 16, 64)
    assert jnp.allclose(out2, ref2, atol=1e-2, rtol=1e-2), (
        f"chunked path mismatch, max abs err {jnp.max(jnp.abs(out2 - ref2))}")

    # 3) bf16 MXU operands (f32 accumulation / GELU), looser tolerance.
    out3 = jax.block_until_ready(
        feed_forward(x2, w1b, b1b, w2b, b2b, compute_dtype=jnp.bfloat16))
    assert out3.dtype == x2.dtype
    assert jnp.allclose(out3, ref2, atol=8e-2, rtol=8e-2), (
        f"bf16 path mismatch, max abs err {jnp.max(jnp.abs(out3 - ref2))}")

    print("KERNEL_OK")
</pallas_src>

<mosaic_0001>
module attributes {stable_mosaic.version = 11 : i64} {
  func.func @_ffn_kernel_resident(%arg0: i32, %arg1: memref<16x128xf32, #tpu.memory_space<vmem>>, %arg2: memref<128x128xf32, #tpu.memory_space<vmem>>, %arg3: memref<128x128xf32, #tpu.memory_space<vmem>>, %arg4: memref<1x128xf32, #tpu.memory_space<vmem>>, %arg5: memref<1x128xf32, #tpu.memory_space<vmem>>, %arg6: memref<128x128xf32, #tpu.memory_space<vmem>>, %arg7: memref<1x128xf32, #tpu.memory_space<vmem>>, %arg8: memref<16x128xf32, #tpu.memory_space<vmem>>) attributes {dimension_semantics = [#tpu.dimension_semantics<parallel>], iteration_bounds = array<i64: 1>, scalar_prefetch = 0 : i64, scratch_operands = 0 : i64, tpu.core_type = #tpu.core_type<tc>, window_params = [{transform_indices = @transform_0, window_bounds = array<i64: 16, 128>}, {pipeline_mode = #tpu.pipeline_mode<synchronous>, transform_indices = @transform_1, window_bounds = array<i64: 128, 128>}, {pipeline_mode = #tpu.pipeline_mode<synchronous>, transform_indices = @transform_2, window_bounds = array<i64: 128, 128>}, {pipeline_mode = #tpu.pipeline_mode<synchronous>, transform_indices = @transform_3, window_bounds = array<i64: 1, 128>}, {pipeline_mode = #tpu.pipeline_mode<synchronous>, transform_indices = @transform_4, window_bounds = array<i64: 1, 128>}, {pipeline_mode = #tpu.pipeline_mode<synchronous>, transform_indices = @transform_5, window_bounds = array<i64: 128, 128>}, {pipeline_mode = #tpu.pipeline_mode<synchronous>, transform_indices = @transform_6, window_bounds = array<i64: 1, 128>}, {transform_indices = @transform_7, window_bounds = array<i64: 16, 128>}]} {
    %c0 = arith.constant 0 : index
    %c0_0 = arith.constant 0 : index
    %0 = vector.load %arg1[%c0, %c0_0] : memref<16x128xf32, #tpu.memory_space<vmem>>, vector<16x128xf32>
    %c0_1 = arith.constant 0 : index
    %c0_2 = arith.constant 0 : index
    %1 = vector.load %arg2[%c0_1, %c0_2] : memref<128x128xf32, #tpu.memory_space<vmem>>, vector<128x128xf32>
    %cst = arith.constant dense<0.000000e+00> : vector<16x128xf32>
    %2 = tpu.matmul %0, %1, %cst {dimension_numbers = #tpu.dot_dimension_numbers<[1], [0], [0], [1], [0, 0, 1, 1], [], []>} : vector<16x128xf32>, vector<128x128xf32>, vector<16x128xf32> -> vector<16x128xf32>
    %c0_3 = arith.constant 0 : index
    %c0_4 = arith.constant 0 : index
    %3 = vector.load %arg4[%c0_3, %c0_4] : memref<1x128xf32, #tpu.memory_space<vmem>>, vector<1x128xf32>
    %4 = vector.broadcast %3 : vector<1x128xf32> to vector<16x128xf32>
    %5 = arith.addf %2, %4 : vector<16x128xf32>
    %c0_5 = arith.constant 0 : index
    %c0_6 = arith.constant 0 : index
    %6 = vector.load %arg3[%c0_5, %c0_6] : memref<128x128xf32, #tpu.memory_space<vmem>>, vector<128x128xf32>
    %cst_7 = arith.constant dense<0.000000e+00> : vector<16x128xf32>
    %7 = tpu.matmul %0, %6, %cst_7 {dimension_numbers = #tpu.dot_dimension_numbers<[1], [0], [0], [1], [0, 0, 1, 1], [], []>} : vector<16x128xf32>, vector<128x128xf32>, vector<16x128xf32> -> vector<16x128xf32>
    %c0_8 = arith.constant 0 : index
    %c0_9 = arith.constant 0 : index
    %8 = vector.load %arg5[%c0_8, %c0_9] : memref<1x128xf32, #tpu.memory_space<vmem>>, vector<1x128xf32>
    %9 = vector.broadcast %8 : vector<1x128xf32> to vector<16x128xf32>
    %10 = arith.addf %7, %9 : vector<16x128xf32>
    %cst_10 = arith.constant 5.000000e-01 : f32
    %11 = vector.broadcast %cst_10 : f32 to vector<16x128xf32>
    %12 = arith.mulf %11, %10 : vector<16x128xf32>
    %cst_11 = arith.constant 0.707106769 : f32
    %13 = vector.broadcast %cst_11 : f32 to vector<16x128xf32>
    %14 = arith.mulf %10, %13 : vector<16x128xf32>
    %cst_12 = arith.constant 0.000000e+00 : f32
    %15 = vector.broadcast %cst_12 : f32 to vector<16x128xf32>
    %16 = arith.cmpf oge, %14, %15 : vector<16x128xf32>
    %cst_13 = arith.constant 1.000000e+00 : f32
    %cst_14 = arith.constant -1.000000e+00 : f32
    %17 = vector.broadcast %cst_13 : f32 to vector<16x128xf32>
    %18 = vector.broadcast %cst_14 : f32 to vector<16x128xf32>
    %19 = arith.select %16, %17, %18 : vector<16x128xi1>, vector<16x128xf32>
    %20 = math.absf %14 : vector<16x128xf32>
    %cst_15 = arith.constant 0.327591091 : f32
    %21 = vector.broadcast %cst_15 : f32 to vector<16x128xf32>
    %22 = arith.mulf %21, %20 : vector<16x128xf32>
    %cst_16 = arith.constant 1.000000e+00 : f32
    %23 = vector.broadcast %cst_16 : f32 to vector<16x128xf32>
    %24 = arith.addf %23, %22 : vector<16x128xf32>
    %25 = tpu.reciprocal %24 {approx = true} : vector<16x128xf32> -> vector<16x128xf32>
    %cst_17 = arith.constant 1.06140542 : f32
    %26 = vector.broadcast %cst_17 : f32 to vector<16x128xf32>
    %27 = arith.mulf %26, %25 : vector<16x128xf32>
    %cst_18 = arith.constant -1.45315206 : f32
    %28 = vector.broadcast %cst_18 : f32 to vector<16x128xf32>
    %29 = arith.addf %27, %28 : vector<16x128xf32>
    %30 = arith.mulf %29, %25 : vector<16x128xf32>
    %cst_19 = arith.constant 1.42141378 : f32
    %31 = vector.broadcast %cst_19 : f32 to vector<16x128xf32>
    %32 = arith.addf %30, %31 : vector<16x128xf32>
    %33 = arith.mulf %32, %25 : vector<16x128xf32>
    %cst_20 = arith.constant -0.284496725 : f32
    %34 = vector.broadcast %cst_20 : f32 to vector<16x128xf32>
    %35 = arith.addf %33, %34 : vector<16x128xf32>
    %36 = arith.mulf %35, %25 : vector<16x128xf32>
    %cst_21 = arith.constant 0.254829586 : f32
    %37 = vector.broadcast %cst_21 : f32 to vector<16x128xf32>
    %38 = arith.addf %36, %37 : vector<16x128xf32>
    %39 = arith.mulf %38, %25 : vector<16x128xf32>
    %cst_22 = arith.constant 0.000000e+00 : f32
    %40 = vector.broadcast %cst_22 : f32 to vector<16x128xf32>
    %41 = arith.subf %40, %20 : vector<16x128xf32>
    %42 = arith.mulf %41, %20 : vector<16x128xf32>
    %43 = math.exp %42 : vector<16x128xf32>
    %44 = arith.mulf %39, %43 : vector<16x128xf32>
    %cst_23 = arith.constant 1.000000e+00 : f32
    %45 = vector.broadcast %cst_23 : f32 to vector<16x128xf32>
    %46 = arith.subf %45, %44 : vector<16x128xf32>
    %47 = arith.mulf %19, %46 : vector<16x128xf32>
    %cst_24 = arith.constant 1.000000e+00 : f32
    %48 = vector.broadcast %cst_24 : f32 to vector<16x128xf32>
    %49 = arith.addf %48, %47 : vector<16x128xf32>
    %50 = arith.mulf %12, %49 : vector<16x128xf32>
    %51 = arith.mulf %5, %50 : vector<16x128xf32>
    %c0_25 = arith.constant 0 : index
    %c0_26 = arith.constant 0 : index
    %52 = vector.load %arg6[%c0_25, %c0_26] : memref<128x128xf32, #tpu.memory_space<vmem>>, vector<128x128xf32>
    %cst_27 = arith.constant dense<0.000000e+00> : vector<16x128xf32>
    %53 = tpu.matmul %51, %52, %cst_27 {dimension_numbers = #tpu.dot_dimension_numbers<[1], [0], [0], [1], [0, 0, 1, 1], [], []>} : vector<16x128xf32>, vector<128x128xf32>, vector<16x128xf32> -> vector<16x128xf32>
    %c0_28 = arith.constant 0 : index
    %c0_29 = arith.constant 0 : index
    %54 = vector.load %arg7[%c0_28, %c0_29] : memref<1x128xf32, #tpu.memory_space<vmem>>, vector<1x128xf32>
    %55 = vector.broadcast %54 : vector<1x128xf32> to vector<16x128xf32>
    %56 = arith.addf %53, %55 : vector<16x128xf32>
    %c0_30 = arith.constant 0 : index
    %c0_31 = arith.constant 0 : index
    %57 = vector.load %arg8[%c0_30, %c0_31] : memref<16x128xf32, #tpu.memory_space<vmem>>, vector<16x128xf32>
    tpu.vector_store %arg8[%c0_30, %c0_31], %56 {strides = array<i32>} : memref<16x128xf32, #tpu.memory_space<vmem>>, vector<16x128xf32>,
    return
  }
  func.func @transform_0(%arg0: i32) -> (i32, i32) {
    %c0_i32 = arith.constant 0 : i32
    %c0_i32_0 = arith.constant 0 : i32
    return %arg0, %c0_i32 : i32, i32
  }
  func.func @transform_1(%arg0: i32) -> (i32, i32) {
    %c0_i32 = arith.constant 0 : i32
    %c0_i32_0 = arith.constant 0 : i32
    %c0_i32_1 = arith.constant 0 : i32
    return %c0_i32, %c0_i32_0 : i32, i32
  }
  func.func @transform_2(%arg0: i32) -> (i32, i32) {
    %c0_i32 = arith.constant 0 : i32
    %c0_i32_0 = arith.constant 0 : i32
    %c0_i32_1 = arith.constant 0 : i32
    return %c0_i32, %c0_i32_0 : i32, i32
  }
  func.func @transform_3(%arg0: i32) -> (i32, i32) {
    %c0_i32 = arith.constant 0 : i32
    %c0_i32_0 = arith.constant 0 : i32
    %c0_i32_1 = arith.constant 0 : i32
    return %c0_i32, %c0_i32_0 : i32, i32
  }
  func.func @transform_4(%arg0: i32) -> (i32, i32) {
    %c0_i32 = arith.constant 0 : i32
    %c0_i32_0 = arith.constant 0 : i32
    %c0_i32_1 = arith.constant 0 : i32
    return %c0_i32, %c0_i32_0 : i32, i32
  }
  func.func @transform_5(%arg0: i32) -> (i32, i32) {
    %c0_i32 = arith.constant 0 : i32
    %c0_i32_0 = arith.constant 0 : i32
    %c0_i32_1 = arith.constant 0 : i32
    return %c0_i32, %c0_i32_0 : i32, i32
  }
  func.func @transform_6(%arg0: i32) -> (i32, i32) {
    %c0_i32 = arith.constant 0 : i32
    %c0_i32_0 = arith.constant 0 : i32
    %c0_i32_1 = arith.constant 0 : i32
    return %c0_i32, %c0_i32_0 : i32, i32
  }
  func.func @transform_7(%arg0: i32) -> (i32, i32) {
    %c0_i32 = arith.constant 0 : i32
    %c0_i32_0 = arith.constant 0 : i32
    return %arg0, %c0_i32 : i32, i32
  }
}

</mosaic_0001>

<bundles_post_ra>
// kernel: tpu_custom_call.1
= control target key start
LH: loop header
LB: loop body
LE: loop exit
PB: predicated region body
PF: predicated region fallthrough
CT: control target
= control target key end

     0   :  { %12 = vsyncpa [#allocation3], 0  ;;  %s552_s0 = inlined_call_operand.hbm [shape: f32[16,128], index: 0, kind: input, shape index: {}]   ;;  %s553_s1 = inlined_call_operand.hbm [shape: f32[128,128], index: 1, kind: input, shape index: {}]   ;;  %s554_s2 = inlined_call_operand.hbm [shape: f32[128,128], index: 2, kind: input, shape index: {}]   ;;  %s555_s3 = inlined_call_operand.vmem [shape: f32[1,128], index: 3, kind: input, shape index: {}]   ;;  %s556_s4 = inlined_call_operand.vmem [shape: f32[1,128], index: 4, kind: input, shape index: {}]   ;;  %s557_s5 = inlined_call_operand.hbm [shape: f32[128,128], index: 5, kind: input, shape index: {}]   ;;  %s558_s6 = inlined_call_operand.vmem [shape: f32[1,128], index: 6, kind: input, shape index: {}]   ;;  %s559_s7 = inlined_call_operand.hbm [shape: f32[16,128], index: 7, kind: output, shape index: {}]  }
   0x1   :  { %13 = vsyncpa [#allocation6], 0 }
   0x2   :  { %14 = vsyncpa [#allocation9], 0 }
   0x3   :  { %15 = vsyncpa [#allocation4], 0  ;;  %s33_s26 = sshll.u32 %s553_s1, 4  ;;  %s461_s27 = smov [#allocation5]   ;;  %s34_s26 = int_to_ptr.hbm [resolvable:$true] %s33_s26 }
   0x4   :  { %s35_s28 = sshll.u32 %s461_s27, 4  ;;  %s20_s8 = sshll.u32 %s552_s0, 4  ;;  %s36_s28 = int_to_ptr.vmem [resolvable:$true] %s35_s28  ;;  %s21_s8 = int_to_ptr.hbm [resolvable:$true] %s20_s8 }
   0x5   :  { %s462_s9 = smov 128   ;;  %s463_s10 = smov 8  }
   0x6   :  { %41 = dma.hbm_to_vmem [thread:$0]  %s34_s26, 2048, %s36_s28, [#allocation6], %s462_s9, %s462_s9, %s463_s10  }
   0x7   :  { %s464_s11 = smov [#allocation2]   ;;  %s46_s1 = sshll.u32 %s554_s2, 4  ;;  %s47_s1 = int_to_ptr.hbm [resolvable:$true] %s46_s1 }
   0x8   :  { %s22_s12 = sshll.u32 %s464_s11, 4  ;;  %s63_s16 = sshll.u32 %s557_s5, 4  ;;  %s23_s12 = int_to_ptr.vmem [resolvable:$true] %s22_s12  ;;  %s64_s16 = int_to_ptr.hbm [resolvable:$true] %s63_s16 }
   0x9   :  { %28 = dma.hbm_to_vmem [thread:$0]  %s21_s8, 256, %s23_s12, [#allocation3], %s462_s9, %s462_s9, %s463_s10  }
   0xa   :  { %s465_s17 = smov [#allocation7]   ;;  %s466_s19 = smov [#allocation8]  }
   0xb   :  { %s48_s18 = sshll.u32 %s465_s17, 4  ;;  %s65_s2 = sshll.u32 %s466_s19, 4  ;;  %s49_s18 = int_to_ptr.vmem [resolvable:$true] %s48_s18  ;;  %s66_s2 = int_to_ptr.vmem [resolvable:$true] %s65_s2 }
   0xc   :  { %54 = dma.hbm_to_vmem [thread:$0]  %s47_s1, 2048, %s49_s18, [#allocation6], %s462_s9, %s462_s9, %s463_s10  }
   0xd   :  { %71 = dma.hbm_to_vmem [thread:$0]  %s64_s16, 2048, %s66_s2, [#allocation9], %s462_s9, %s462_s9, %s463_s10  }
   0xe   :  { %453 = dma.done.wait [#allocation3], 256  }
   0xf   :  { %454 = vsyncadd [#allocation3], 4294967040 }
  0x10   :  { %455 = dma.done.wait [#allocation6], 4096  }
  0x11   :  { %456 = vsyncadd [#allocation6], 4294963200 }
  0x12   :  { %457 = dma.done.wait [#allocation9], 2048  }
  0x13   :  { %458 = vsyncadd [#allocation9], 4294965248  ;;  %v150_v0 = vld [vmem:[#allocation7 + $0x78] sm:$0xff]  ;;  %v149_v1 = vld [vmem:[#allocation7 + $0x70] sm:$0xff]  ;;  %s468_s23 = smov [#allocation10]   ;;  %s283_s27 = sshll.u32 %s559_s7, 4  ;;  %s284_s27 = int_to_ptr.hbm [resolvable:$true] %s283_s27 }
  0x14   :  { %155 = vmatpush.msra.mxu1 %v150_v0  ;;  %v148_v2 = vld [vmem:[#allocation7 + $0x68] sm:$0xff]  ;;  %v147_v3 = vld [vmem:[#allocation7 + $0x60] sm:$0xff]  ;;  %v146_v4 = vld [vmem:[#allocation7 + $0x58] sm:$0xff]  ;;  %s281_s24 = sshll.u32 %s468_s23, 4  ;;  %s282_s24 = int_to_ptr.vmem [resolvable:$true] %s281_s24 }
  0x15   :  { %v145_v5 = vld [vmem:[#allocation7 + $0x50] sm:$0xff]  ;;  %v107_v6 = vld [vmem:[#allocation5 + $0x78] sm:$0xff]  ;;  %v144_v8 = vld [vmem:[#allocation7 + $0x48] sm:$0xff] }
  0x16   :  { %156 = vmatpush.msra.mxu1 %v149_v1  ;;  %v106_v7 = vld [vmem:[#allocation5 + $0x70] sm:$0xff]  ;;  %112 = vmatpush.msra.mxu0 %v107_v6  ;;  %v105_v9 = vld [vmem:[#allocation5 + $0x68] sm:$0xff]  ;;  %v143_v10 = vld [vmem:[#allocation7 + $0x40] sm:$0xff] }
  0x17   :  { %298 = vmatpush.msra.mxu3 %v107_v6  ;;  %v104_v11 = vld [vmem:[#allocation5 + $0x60] sm:$0xff]  ;;  %v142_v12 = vld [vmem:[#allocation7 + $0x38] sm:$0xff]  ;;  %v141_v14 = vld [vmem:[#allocation7 + $0x30] sm:$0xff] }
  0x18   :  { %157 = vmatpush.msra.mxu1 %v148_v2  ;;  %113 = vmatpush.msra.mxu0 %v106_v7  ;;  %v103_v13 = vld [vmem:[#allocation5 + $0x58] sm:$0xff]  ;;  %v102_v15 = vld [vmem:[#allocation5 + $0x50] sm:$0xff]  ;;  %v140_v16 = vld [vmem:[#allocation7 + $0x28] sm:$0xff] }
  0x19   :  { %299 = vmatpush.msra.mxu3 %v106_v7  ;;  %v101_v17 = vld [vmem:[#allocation5 + $0x48] sm:$0xff]  ;;  %v139_v18 = vld [vmem:[#allocation7 + $0x20] sm:$0xff]  ;;  %v138_v20 = vld [vmem:[#allocation7 + $0x18] sm:$0xff] }
  0x1a   :  { %158 = vmatpush.msra.mxu1 %v147_v3  ;;  %114 = vmatpush.msra.mxu0 %v105_v9  ;;  %v100_v19 = vld [vmem:[#allocation5 + $0x40] sm:$0xff]  ;;  %v99_v21 = vld [vmem:[#allocation5 + $0x38] sm:$0xff]  ;;  %v137_v22 = vld [vmem:[#allocation7 + $0x10] sm:$0xff] }
  0x1b   :  { %300 = vmatpush.msra.mxu3 %v105_v9  ;;  %v98_v23 = vld [vmem:[#allocation5 + $0x30] sm:$0xff]  ;;  %v136_v24 = vld [vmem:[#allocation7 + $0x8] sm:$0xff]  ;;  %v135_v26 = vld [vmem:[#allocation7] sm:$0xff] }
  0x1c   :  { %159 = vmatpush.msra.mxu1 %v146_v4  ;;  %115 = vmatpush.msra.mxu0 %v104_v11  ;;  %v97_v25 = vld [vmem:[#allocation5 + $0x28] sm:$0xff]  ;;  %v96_v27 = vld [vmem:[#allocation5 + $0x20] sm:$0xff]  ;;  %v90_v28 = vld [vmem:[#allocation2] sm:$0xff] }
  0x1d   :  { %301 = vmatpush.msra.mxu3 %v104_v11  ;;  %v95_v29 = vld [vmem:[#allocation5 + $0x18] sm:$0xff]  ;;  %v94_v30 = vld [vmem:[#allocation5 + $0x10] sm:$0xff]  ;;  %v93_v31 = vld [vmem:[#allocation5 + $0x8] sm:$0xff] }
  0x1e   :  { %160 = vmatpush.msra.mxu1 %v145_v5  ;;  %116 = vmatpush.msra.mxu0 %v103_v13  ;;  %v92_v32 = vld [vmem:[#allocation5] sm:$0xff]  ;;  %v91_v33 = vld [vmem:[#allocation2 + $0x8] sm:$0xff]  ;;  %v246_v35 = vld [vmem:[#allocation8 + $0x70] sm:$0xff] }
  0x1f   :  { %302 = vmatpush.msra.mxu3 %v103_v13  ;;  %v247_v34 = vld [vmem:[#allocation8 + $0x78] sm:$0xff]  ;;  %v245_v36 = vld [vmem:[#allocation8 + $0x68] sm:$0xff]  ;;  %v244_v37 = vld [vmem:[#allocation8 + $0x60] sm:$0xff] }
  0x20   :  { %161 = vmatpush.msra.mxu1 %v144_v8  ;;  %117 = vmatpush.msra.mxu0 %v102_v15  ;;  %v243_v38 = vld [vmem:[#allocation8 + $0x58] sm:$0xff]  ;;  %v242_v39 = vld [vmem:[#allocation8 + $0x50] sm:$0xff]  ;;  %v241_v40 = vld [vmem:[#allocation8 + $0x48] sm:$0xff] }
  0x21   :  { %303 = vmatpush.msra.mxu3 %v102_v15  ;;  %252 = vmatpush.msra.mxu2 %v247_v34  ;;  %v240_v41 = vld [vmem:[#allocation8 + $0x40] sm:$0xff]  ;;  %v322_v42 = vld [vmem:[%s556_s4] ss:$0 sm:$0xff]  ;;  %v239_v43 = vld [vmem:[#allocation8 + $0x38] sm:$0xff] }
  0x22   :  { %162 = vmatpush.msra.mxu1 %v143_v10  ;;  %118 = vmatpush.msra.mxu0 %v101_v17  ;;  %v238_v45 = vld [vmem:[#allocation8 + $0x30] sm:$0xff]  ;;  %v237_v47 = vld [vmem:[#allocation8 + $0x28] sm:$0xff]  ;;  %v236_v49 = vld [vmem:[#allocation8 + $0x20] sm:$0xff] }
  0x23   :  { %304 = vmatpush.msra.mxu3 %v101_v17  ;;  %253 = vmatpush.msra.mxu2 %v246_v35  ;;  %v235_v51 = vld [vmem:[#allocation8 + $0x18] sm:$0xff]  ;;  %v234_v54 = vld [vmem:[#allocation8 + $0x10] sm:$0xff]  ;;  %v233_v57 = vld [vmem:[#allocation8 + $0x8] sm:$0xff] }
  0x24   :  { %163 = vmatpush.msra.mxu1 %v142_v12  ;;  %119 = vmatpush.msra.mxu0 %v100_v19  ;;  %v232_v59 = vld [vmem:[#allocation8] sm:$0xff] }
  0x25   :  { %305 = vmatpush.msra.mxu3 %v100_v19  ;;  %254 = vmatpush.msra.mxu2 %v245_v36 }
  0x26   :  { %164 = vmatpush.msra.mxu1 %v141_v14  ;;  %120 = vmatpush.msra.mxu0 %v99_v21 }
  0x27   :  { %306 = vmatpush.msra.mxu3 %v99_v21  ;;  %255 = vmatpush.msra.mxu2 %v244_v37 }
  0x28   :  { %165 = vmatpush.msra.mxu1 %v140_v16  ;;  %121 = vmatpush.msra.mxu0 %v98_v23 }
  0x29   :  { %307 = vmatpush.msra.mxu3 %v98_v23  ;;  %256 = vmatpush.msra.mxu2 %v243_v38 }
  0x2a   :  { %166 = vmatpush.msra.mxu1 %v139_v18  ;;  %122 = vmatpush.msra.mxu0 %v97_v25 }
  0x2b   :  { %308 = vmatpush.msra.mxu3 %v97_v25  ;;  %257 = vmatpush.msra.mxu2 %v242_v39 }
  0x2c   :  { %167 = vmatpush.msra.mxu1 %v138_v20  ;;  %123 = vmatpush.msra.mxu0 %v96_v27 }
  0x2d   :  { %309 = vmatpush.msra.mxu3 %v96_v27  ;;  %258 = vmatpush.msra.mxu2 %v241_v40  ;;  %v467_v27 = vmov -1.0  }
  0x2e   :  { %168 = vmatpush.msra.mxu1 %v137_v22  ;;  %124 = vmatpush.msra.mxu0 %v95_v29 }
  0x2f   :  { %310 = vmatpush.msra.mxu3 %v95_v29  ;;  %259 = vmatpush.msra.mxu2 %v240_v41 }
  0x30   :  { %169 = vmatpush.msra.mxu1 %v136_v24  ;;  %125 = vmatpush.msra.mxu0 %v94_v30  ;;  %v323_v24 = vld [vmem:[%s555_s3] ss:$0 sm:$0xff] }
  0x31   :  { %311 = vmatpush.msra.mxu3 %v94_v30  ;;  %260 = vmatpush.msra.mxu2 %v239_v43 }
  0x32   :  { %170 = vmatpush.msra.mxu1 %v135_v26  ;;  %126 = vmatpush.msra.mxu0 %v93_v31 }
  0x33   :  { %171 = vmatmul.f32.vlgmr.msra.gmra.mxu1 %v90_v28  ;;  %312 = vmatpush.msra.mxu3 %v93_v31 }
  0x34   :  { %127 = vmatpush.msra.mxu0 %v92_v32  ;;  %261 = vmatpush.msra.mxu2 %v238_v45 }
  0x35   :  { %128 = vmatmul.f32.vlgmr.msra.gmra.mxu0 %v90_v28  ;;  %313 = vmatpush.msra.mxu3 %v92_v32 }
  0x36   :  { %131 = vmatmul.f32.vlgmr.msra.gmra.mxu3 %v91_v33  ;;  %262 = vmatpush.msra.mxu2 %v237_v47 }
  0x38   :  { %263 = vmatpush.msra.mxu2 %v236_v49 }
  0x3a   :  { %264 = vmatpush.msra.mxu2 %v235_v51 }
  0x3b   :  { %174 = vmatmul.f32.gmra.mxu1 %v91_v33 }
  0x3c   :  { %265 = vmatpush.msra.mxu2 %v234_v54 }
  0x3e   :  { %266 = vmatpush.msra.mxu2 %v233_v57 }
  0x40   :  { %267 = vmatpush.msra.mxu2 %v232_v59 }
  0xb0   :  { %v172_v44 = vpop.f32.mrf.mxu1 }
  0xb1   :  { %v173_v46 = vadd.f32 %v322_v42, %v172_v44 }
  0xb2   :  { %v129_v29 = vpop.f32.mrf.mxu0 }
  0xb3   :  { %v180_v48 = vmul.f32 0.70710677, %v173_v46  ;;  %v178_v32 = vmul.f32 0.5, %v173_v46  ;;  %v130_v33 = vadd.f32 %v323_v24, %v129_v29  ;;  %v324_v46 = vld [vmem:[%s558_s6] ss:$0 sm:$0xff] }
  0xb5   :  { %v186_v50 = vand.u32 2147483647, %v180_v48  ;;  %vm182_vm0 = vcmp.ge.f32.partialorder %v180_v48, 0.0 }
  0xb6   :  { %v184_v28 = vsel %vm182_vm0, 1.0, %v467_v27 }
  0xb7   :  { %v188_v52 = vmul.f32 0.3275911, %v186_v50  ;;  %v212_v63 = vsub.f32 0.0, %v186_v50 }
  0xb8   :  { %v175_v53 = vpop.f32.mrf.mxu1 }
  0xb9   :  { %v190_v55 = vadd.f32 1.0, %v188_v52  ;;  %v536_v56 = vadd.f32 %v322_v42, %v175_v53  ;;  %v214_v3 = vmul.f32 %v212_v63, %v186_v50  ;;  %v132_v42 = vpop.f32.mrf.mxu3 }
  0xba   :  { %v133_v45 = vadd.f32 %v323_v24, %v132_v42 }
  0xbb   :  { %325 = vrcp.f32 %v190_v55  ;;  %v181_v58 = vmul.f32 0.70710677, %v536_v56  ;;  %v216_v7 = vmul.f32 1.442695, %v214_v3  ;;  %v179_v44 = vmul.f32 0.5, %v536_v56 }
  0xbd   :  { %v187_v60 = vand.u32 2147483647, %v181_v58  ;;  %vm183_vm1 = vcmp.ge.f32.partialorder %v181_v58, 0.0 }
  0xbe   :  { %v185_v41 = vsel %vm183_vm1, 1.0, %v467_v27 }
  0xbf   :  { %v189_v61 = vmul.f32 0.3275911, %v187_v60  ;;  %v213_v8 = vsub.f32 0.0, %v187_v60 }
  0xc1   :  { %v326_v62 = vpop.eup %325  ;;  %v191_v0 = vadd.f32 1.0, %v189_v61  ;;  %v215_v13 = vmul.f32 %v213_v8, %v187_v60 }
  0xc2   :  { %v194_v1 = vmul.f32 1.0614054, %v326_v62 }
  0xc3   :  { %327 = vrcp.f32 %v191_v0  ;;  %v218_v18 = vmul.f32 1.442695, %v215_v13 }
  0xc4   :  { %v196_v2 = vadd.f32 -1.4531521, %v194_v1  ;;  %329 = vpow2.f32 %v216_v7 }
  0xc5   :  { %331 = vpow2.f32 %v218_v18 }
  0xc6   :  { %v198_v4 = vmul.f32 %v326_v62, %v196_v2 }
  0xc8   :  { %v200_v5 = vadd.f32 1.4214138, %v198_v4 }
  0xc9   :  { %v328_v6 = vpop.eup %327 }
  0xca   :  { %v202_v9 = vmul.f32 %v326_v62, %v200_v5  ;;  %v195_v10 = vmul.f32 1.0614054, %v328_v6  ;;  %v330_v21 = vpop.eup %329 }
  0xcb   :  { %v332_v36 = vpop.eup %331 }
  0xcc   :  { %v204_v11 = vadd.f32 -0.28449672, %v202_v9  ;;  %v197_v12 = vadd.f32 -1.4531521, %v195_v10 }
  0xce   :  { %v206_v14 = vmul.f32 %v326_v62, %v204_v11  ;;  %v199_v15 = vmul.f32 %v328_v6, %v197_v12 }
  0xd0   :  { %v208_v16 = vadd.f32 0.2548296, %v206_v14  ;;  %v201_v17 = vadd.f32 1.4214138, %v199_v15 }
  0xd2   :  { %v210_v19 = vmul.f32 %v326_v62, %v208_v16  ;;  %v203_v20 = vmul.f32 %v328_v6, %v201_v17 }
  0xd4   :  { %v220_v22 = vmul.f32 %v330_v21, %v210_v19  ;;  %v205_v23 = vadd.f32 -0.28449672, %v203_v20 }
  0xd6   :  { %v222_v25 = vsub.f32 1.0, %v220_v22  ;;  %v207_v26 = vmul.f32 %v328_v6, %v205_v23 }
  0xd8   :  { %v224_v30 = vmul.f32 %v222_v25, %v184_v28  ;;  %v209_v31 = vadd.f32 0.2548296, %v207_v26 }
  0xda   :  { %v226_v34 = vadd.f32 1.0, %v224_v30  ;;  %v211_v35 = vmul.f32 %v328_v6, %v209_v31 }
  0xdc   :  { %v228_v37 = vmul.f32 %v226_v34, %v178_v32  ;;  %v221_v38 = vmul.f32 %v332_v36, %v211_v35 }
  0xde   :  { %v230_v39 = vmul.f32 %v228_v37, %v130_v33  ;;  %v223_v40 = vsub.f32 1.0, %v221_v38 }
  0xe0   :  { %268 = vmatmul.f32.vlgmr.msra.gmra.mxu2 %v230_v39  ;;  %v225_v43 = vmul.f32 %v223_v40, %v185_v41 }
  0xe2   :  { %v227_v47 = vadd.f32 1.0, %v225_v43 }
  0xe4   :  { %v229_v48 = vmul.f32 %v227_v47, %v179_v44 }
  0xe6   :  { %v231_v49 = vmul.f32 %v229_v48, %v133_v45 }
  0xe8   :  { %271 = vmatmul.f32.gmra.mxu2 %v231_v49 }
 0x163   :  { %v269_v50 = vpop.f32.mrf.mxu2 }
 0x164   :  { %v270_v51 = vadd.f32 %v324_v46, %v269_v50 }
 0x166   :  { %275 = vst [vmem:[#allocation10] sm:$0xff] %v270_v51 }
 0x16b   :  { %v272_v52 = vpop.f32.mrf.mxu2 }
 0x16c   :  { %v273_v53 = vadd.f32 %v324_v46, %v272_v52 }
 0x16e   :  { %276 = vst [vmem:[#allocation10 + $0x8] sm:$0xff] %v273_v53 }
 0x16f   :  { %289 = dma.vmem_to_hbm [thread:$0]  %s282_s24, 256, %s284_s27, [#allocation4], %s462_s9, %s462_s9, %s463_s10  }
 0x170   :  { %459 = dma.done.wait [#allocation4], 256  }
 0x171   :  { %460 = vsyncadd [#allocation4], 4294967040 }
 0x172   :  { %294 = vsyncpa [#allocation3], 1 }
 0x173   :  { %295 = vsyncpa [#allocation6], 1 }
 0x174   :  { %296 = vsyncpa [#allocation9], 1 }
 0x175   :  { %297 = vsyncpa [#allocation4], 1 }

</bundles_post_ra>
